<compile_context>
chip_gen: v7x
topology: tpu7x:2x2x1
jax: 0.10.0
libtpu: 0.0.40
codegen_flags: <defaults>
</compile_context>

<pallas_src>
import functools

import jax
import jax.numpy as jnp
import numpy as np
from jax import lax
from jax.experimental import pallas as pl
from jax.experimental.pallas import tpu as pltpu


# ----------------------------------------------------------------------------
# Fused Pallas kernel: LSTM layer-0 recurrence + FC projection, one invocation.
# Gate column order inside the kernel is [i, f, o, g].
# ----------------------------------------------------------------------------
def _lstm_fc_kernel(x_ref, w_ih_ref, w_hh_ref, b_ref, w_fc_ref, b_fc_ref, o_ref,
                    *, batch, seq_len):
    H = w_hh_ref.shape[0]

    # Phase 1 (hoisted off the serial critical path): input projection + bias
    # for every timestep in ONE MXU matmul: (T*B, Din) @ (Din, 4H) + (1, 4H).
    xw = (jnp.dot(x_ref[...], w_ih_ref[...], preferred_element_type=jnp.float32)
          + b_ref[...])                                   # (T*B, 4H)
    w_hh = w_hh_ref[...]                                  # (H, 4H), loaded once

    h = jnp.zeros((batch, H), jnp.float32)
    c = jnp.zeros((batch, H), jnp.float32)

    # Phase 2: the un-pipelinable recurrence. seq_len is static & small, so this
    # Python loop is fully unrolled at trace time (== fori_loop(..., unroll=True));
    # each step is a single (B,H)@(H,4H) MXU matmul + VPU/EUP gate math.
    for t in range(seq_len):
        gates = xw[t * batch:(t + 1) * batch, :] + jnp.dot(
            h, w_hh, preferred_element_type=jnp.float32)  # (B, 4H)
        # Gate columns are pre-ordered [i, f, o, g]: one sigmoid over the
        # contiguous (B, 3H) slab, one tanh over the trailing (B, H).
        ifo = jax.nn.sigmoid(gates[:, :3 * H])
        g_g = jnp.tanh(gates[:, 3 * H:])
        c = ifo[:, H:2 * H] * c + ifo[:, :H] * g_g        # f*c + i*g
        h = ifo[:, 2 * H:3 * H] * jnp.tanh(c)             # o*tanh(c)

    # Phase 3: fused FC head. Dropout(p=0.4) is identity at inference.
    # TODO(synk): training-mode dropout RNG mask not implemented (eval only).
    o_ref[...] = (jnp.dot(h, w_fc_ref[...], preferred_element_type=jnp.float32)
                  + b_fc_ref[...])


@jax.jit
def lstm_model_forward(x, kparams):
    """x: (B, T, Din) batch-first, like the PyTorch module. Returns (B, 1)."""
    B, T, Din = x.shape
    # Layout plumbing in XLA: batch-first -> time-major, flattened to (T*B, Din)
    # so row index = t*B + b and the hoisted projection is a single dense matmul.
    x_flat = jnp.transpose(x, (1, 0, 2)).reshape(T * B, Din)
    kernel = functools.partial(_lstm_fc_kernel, batch=B, seq_len=T)
    # Everything fits comfortably in VMEM (a few KB); whole-array blocks, no grid.
    # (At large hidden_dim: switch weights to bf16 and tile the 4H gate axis to
    #  stay within v7x's 64 MiB VMEM; shard batch across the 2 TCs when B >= 16.)
    return pl.pallas_call(
        kernel,
        out_shape=jax.ShapeDtypeStruct((B, 1), jnp.float32),
    )(x_flat, kparams["w_ih0"], kparams["w_hh0"], kparams["b0"],
      kparams["w_fc"], kparams["b_fc"])


# ----------------------------------------------------------------------------
# Parameter packing: PyTorch gate order [i,f,g,o] -> kernel order [i,f,o,g];
# only layer 0 is kept (layers >= 1 never influence fc(hn[0])).
# ----------------------------------------------------------------------------
def pack_kernel_params(params):
    H = params["w_hh"][0].shape[0]

    def reorder(w):  # columns [i,f,g,o] -> [i,f,o,g]
        i, f, g, o = (w[..., 0 * H:1 * H], w[..., 1 * H:2 * H],
                      w[..., 2 * H:3 * H], w[..., 3 * H:4 * H])
        return jnp.concatenate([i, f, o, g], axis=-1)

    return {
        "w_ih0": reorder(params["w_ih"][0]),   # (Din, 4H)
        "w_hh0": reorder(params["w_hh"][0]),   # (H, 4H)
        "b0": reorder(params["b"][0]),         # (1, 4H)  (b_ih + b_hh pre-summed)
        "w_fc": params["w_fc"],                # (H, 1)
        "b_fc": params["b_fc"],                # (1, 1)
    }


# ----------------------------------------------------------------------------
# Pure-JAX reference (faithful to the PyTorch module: runs all LSTM layers,
# then fc(hn[0])). Uses the standard PyTorch gate order [i,f,g,o].
# ----------------------------------------------------------------------------
def lstm_model_reference(x, params):
    n_layers = len(params["w_ih"])
    B = x.shape[0]
    hn_per_layer = []
    inp = jnp.transpose(x, (1, 0, 2))        # (T, B, D)
    for layer in range(n_layers):
        w_ih = params["w_ih"][layer]
        w_hh = params["w_hh"][layer]
        b = params["b"][layer]
        H = w_hh.shape[0]

        def step(carry, x_t):
            h, c = carry
            gates = x_t @ w_ih + h @ w_hh + b
            i_g = jax.nn.sigmoid(gates[:, 0 * H:1 * H])
            f_g = jax.nn.sigmoid(gates[:, 1 * H:2 * H])
            g_g = jnp.tanh(gates[:, 2 * H:3 * H])
            o_g = jax.nn.sigmoid(gates[:, 3 * H:4 * H])
            c = f_g * c + i_g * g_g
            h = o_g * jnp.tanh(c)
            return (h, c), h

        h0 = jnp.zeros((B, H), jnp.float32)
        c0 = jnp.zeros((B, H), jnp.float32)
        (hn, _), out_seq = lax.scan(step, (h0, c0), inp)
        hn_per_layer.append(hn)
        inp = out_seq
    return hn_per_layer[0] @ params["w_fc"] + params["b_fc"]


# ----------------------------------------------------------------------------
# Deterministic parameter init (PyTorch-like U(-1/sqrt(H), 1/sqrt(H))).
# Weights stored pre-transposed: w_ih (Din, 4H), w_hh (H, 4H), w_fc (H, 1);
# LSTM biases b_ih + b_hh pre-summed into a single (1, 4H) row.
# ----------------------------------------------------------------------------
def init_params(key, input_dim, hidden_dim, n_layers):
    bound = 1.0 / np.sqrt(hidden_dim)
    params = {"w_ih": [], "w_hh": [], "b": []}
    for layer in range(n_layers):
        d_in = input_dim if layer == 0 else hidden_dim
        key, k1, k2, k3, k4 = jax.random.split(key, 5)
        w_ih = jax.random.uniform(k1, (d_in, 4 * hidden_dim), jnp.float32, -bound, bound)
        w_hh = jax.random.uniform(k2, (hidden_dim, 4 * hidden_dim), jnp.float32, -bound, bound)
        b_ih = jax.random.uniform(k3, (4 * hidden_dim,), jnp.float32, -bound, bound)
        b_hh = jax.random.uniform(k4, (4 * hidden_dim,), jnp.float32, -bound, bound)
        params["w_ih"].append(w_ih)
        params["w_hh"].append(w_hh)
        params["b"].append((b_ih + b_hh).reshape(1, 4 * hidden_dim))
    key, k5, k6 = jax.random.split(key, 3)
    fc_bound = 1.0 / np.sqrt(hidden_dim)
    params["w_fc"] = jax.random.uniform(k5, (hidden_dim, 1), jnp.float32, -fc_bound, fc_bound)
    params["b_fc"] = jax.random.uniform(k6, (1, 1), jnp.float32, -fc_bound, fc_bound)
    return params


if __name__ == "__main__":
    # LSTMModel(input_dim=8, hidden_dim=32, n_layers=2, output_dim=1)
    B, T, INPUT_DIM, HIDDEN_DIM, N_LAYERS = 2, 8, 8, 32, 2

    key = jax.random.PRNGKey(0)
    key, kx, kp = jax.random.split(key, 3)
    x = jax.random.normal(kx, (B, T, INPUT_DIM), jnp.float32)
    params = init_params(kp, INPUT_DIM, HIDDEN_DIM, N_LAYERS)
    kparams = pack_kernel_params(params)

    out = jax.block_until_ready(lstm_model_forward(x, kparams))
    ref = jax.block_until_ready(lstm_model_reference(x, params))

    assert out.shape == (B, 1), out.shape
    np.testing.assert_allclose(np.asarray(out), np.asarray(ref), rtol=1e-5, atol=1e-5)
    print("KERNEL_OK")
</pallas_src>

<mosaic_0001>
module attributes {stable_mosaic.version = 11 : i64} {
  func.func @_lstm_fc_kernel(%arg0: memref<16x8xf32, #tpu.memory_space<vmem>>, %arg1: memref<8x128xf32, #tpu.memory_space<vmem>>, %arg2: memref<32x128xf32, #tpu.memory_space<vmem>>, %arg3: memref<1x128xf32, #tpu.memory_space<vmem>>, %arg4: memref<32x1xf32, #tpu.memory_space<vmem>>, %arg5: memref<1x1xf32, #tpu.memory_space<vmem>>, %arg6: memref<2x1xf32, #tpu.memory_space<vmem>>) attributes {dimension_semantics = [], scalar_prefetch = 0 : i64, scratch_operands = 0 : i64, tpu.core_type = #tpu.core_type<tc>} {
    %c0 = arith.constant 0 : index
    %c0_0 = arith.constant 0 : index
    %0 = vector.load %arg0[%c0, %c0_0] : memref<16x8xf32, #tpu.memory_space<vmem>>, vector<16x8xf32>
    %c0_1 = arith.constant 0 : index
    %c0_2 = arith.constant 0 : index
    %1 = vector.load %arg1[%c0_1, %c0_2] : memref<8x128xf32, #tpu.memory_space<vmem>>, vector<8x128xf32>
    %cst = arith.constant dense<0.000000e+00> : vector<16x128xf32>
    %2 = tpu.matmul %0, %1, %cst {dimension_numbers = #tpu.dot_dimension_numbers<[1], [0], [0], [1], [0, 0, 1, 1], [], []>} : vector<16x8xf32>, vector<8x128xf32>, vector<16x128xf32> -> vector<16x128xf32>
    %c0_3 = arith.constant 0 : index
    %c0_4 = arith.constant 0 : index
    %3 = vector.load %arg3[%c0_3, %c0_4] : memref<1x128xf32, #tpu.memory_space<vmem>>, vector<1x128xf32>
    %4 = vector.broadcast %3 : vector<1x128xf32> to vector<16x128xf32>
    %5 = arith.addf %2, %4 : vector<16x128xf32>
    %c0_5 = arith.constant 0 : index
    %c0_6 = arith.constant 0 : index
    %6 = vector.load %arg2[%c0_5, %c0_6] : memref<32x128xf32, #tpu.memory_space<vmem>>, vector<32x128xf32>
    %cst_7 = arith.constant 0.000000e+00 : f32
    %7 = vector.broadcast %cst_7 : f32 to vector<2x32xf32>
    %cst_8 = arith.constant 0.000000e+00 : f32
    %8 = vector.broadcast %cst_8 : f32 to vector<2x32xf32>
    %9 = vector.extract_strided_slice %5 {offsets = [0, 0], sizes = [2, 128], strides = [1, 1]} : vector<16x128xf32> to vector<2x128xf32>
    %cst_9 = arith.constant dense<0.000000e+00> : vector<2x128xf32>
    %10 = tpu.matmul %7, %6, %cst_9 {dimension_numbers = #tpu.dot_dimension_numbers<[1], [0], [0], [1], [0, 0, 1, 1], [], []>} : vector<2x32xf32>, vector<32x128xf32>, vector<2x128xf32> -> vector<2x128xf32>
    %11 = arith.addf %9, %10 : vector<2x128xf32>
    %12 = vector.extract_strided_slice %11 {offsets = [0, 0], sizes = [2, 96], strides = [1, 1]} : vector<2x128xf32> to vector<2x96xf32>
    %13 = arith.negf %12 : vector<2x96xf32>
    %14 = math.exp %13 : vector<2x96xf32>
    %cst_10 = arith.constant 1.000000e+00 : f32
    %15 = vector.broadcast %cst_10 : f32 to vector<2x96xf32>
    %16 = arith.addf %15, %14 : vector<2x96xf32>
    %17 = arith.divf %15, %16 : vector<2x96xf32>
    %18 = vector.extract_strided_slice %11 {offsets = [0, 96], sizes = [2, 32], strides = [1, 1]} : vector<2x128xf32> to vector<2x32xf32>
    %19 = math.tanh %18 : vector<2x32xf32>
    %20 = vector.extract_strided_slice %17 {offsets = [0, 32], sizes = [2, 32], strides = [1, 1]} : vector<2x96xf32> to vector<2x32xf32>
    %21 = arith.mulf %20, %8 : vector<2x32xf32>
    %22 = vector.extract_strided_slice %17 {offsets = [0, 0], sizes = [2, 32], strides = [1, 1]} : vector<2x96xf32> to vector<2x32xf32>
    %23 = arith.mulf %22, %19 : vector<2x32xf32>
    %24 = arith.addf %21, %23 : vector<2x32xf32>
    %25 = vector.extract_strided_slice %17 {offsets = [0, 64], sizes = [2, 32], strides = [1, 1]} : vector<2x96xf32> to vector<2x32xf32>
    %26 = math.tanh %24 : vector<2x32xf32>
    %27 = arith.mulf %25, %26 : vector<2x32xf32>
    %28 = vector.extract_strided_slice %5 {offsets = [2, 0], sizes = [2, 128], strides = [1, 1]} : vector<16x128xf32> to vector<2x128xf32>
    %cst_11 = arith.constant dense<0.000000e+00> : vector<2x128xf32>
    %29 = tpu.matmul %27, %6, %cst_11 {dimension_numbers = #tpu.dot_dimension_numbers<[1], [0], [0], [1], [0, 0, 1, 1], [], []>} : vector<2x32xf32>, vector<32x128xf32>, vector<2x128xf32> -> vector<2x128xf32>
    %30 = arith.addf %28, %29 : vector<2x128xf32>
    %31 = vector.extract_strided_slice %30 {offsets = [0, 0], sizes = [2, 96], strides = [1, 1]} : vector<2x128xf32> to vector<2x96xf32>
    %32 = arith.negf %31 : vector<2x96xf32>
    %33 = math.exp %32 : vector<2x96xf32>
    %cst_12 = arith.constant 1.000000e+00 : f32
    %34 = vector.broadcast %cst_12 : f32 to vector<2x96xf32>
    %35 = arith.addf %34, %33 : vector<2x96xf32>
    %36 = arith.divf %34, %35 : vector<2x96xf32>
    %37 = vector.extract_strided_slice %30 {offsets = [0, 96], sizes = [2, 32], strides = [1, 1]} : vector<2x128xf32> to vector<2x32xf32>
    %38 = math.tanh %37 : vector<2x32xf32>
    %39 = vector.extract_strided_slice %36 {offsets = [0, 32], sizes = [2, 32], strides = [1, 1]} : vector<2x96xf32> to vector<2x32xf32>
    %40 = arith.mulf %39, %24 : vector<2x32xf32>
    %41 = vector.extract_strided_slice %36 {offsets = [0, 0], sizes = [2, 32], strides = [1, 1]} : vector<2x96xf32> to vector<2x32xf32>
    %42 = arith.mulf %41, %38 : vector<2x32xf32>
    %43 = arith.addf %40, %42 : vector<2x32xf32>
    %44 = vector.extract_strided_slice %36 {offsets = [0, 64], sizes = [2, 32], strides = [1, 1]} : vector<2x96xf32> to vector<2x32xf32>
    %45 = math.tanh %43 : vector<2x32xf32>
    %46 = arith.mulf %44, %45 : vector<2x32xf32>
    %47 = vector.extract_strided_slice %5 {offsets = [4, 0], sizes = [2, 128], strides = [1, 1]} : vector<16x128xf32> to vector<2x128xf32>
    %cst_13 = arith.constant dense<0.000000e+00> : vector<2x128xf32>
    %48 = tpu.matmul %46, %6, %cst_13 {dimension_numbers = #tpu.dot_dimension_numbers<[1], [0], [0], [1], [0, 0, 1, 1], [], []>} : vector<2x32xf32>, vector<32x128xf32>, vector<2x128xf32> -> vector<2x128xf32>
    %49 = arith.addf %47, %48 : vector<2x128xf32>
    %50 = vector.extract_strided_slice %49 {offsets = [0, 0], sizes = [2, 96], strides = [1, 1]} : vector<2x128xf32> to vector<2x96xf32>
    %51 = arith.negf %50 : vector<2x96xf32>
    %52 = math.exp %51 : vector<2x96xf32>
    %cst_14 = arith.constant 1.000000e+00 : f32
    %53 = vector.broadcast %cst_14 : f32 to vector<2x96xf32>
    %54 = arith.addf %53, %52 : vector<2x96xf32>
    %55 = arith.divf %53, %54 : vector<2x96xf32>
    %56 = vector.extract_strided_slice %49 {offsets = [0, 96], sizes = [2, 32], strides = [1, 1]} : vector<2x128xf32> to vector<2x32xf32>
    %57 = math.tanh %56 : vector<2x32xf32>
    %58 = vector.extract_strided_slice %55 {offsets = [0, 32], sizes = [2, 32], strides = [1, 1]} : vector<2x96xf32> to vector<2x32xf32>
    %59 = arith.mulf %58, %43 : vector<2x32xf32>
    %60 = vector.extract_strided_slice %55 {offsets = [0, 0], sizes = [2, 32], strides = [1, 1]} : vector<2x96xf32> to vector<2x32xf32>
    %61 = arith.mulf %60, %57 : vector<2x32xf32>
    %62 = arith.addf %59, %61 : vector<2x32xf32>
    %63 = vector.extract_strided_slice %55 {offsets = [0, 64], sizes = [2, 32], strides = [1, 1]} : vector<2x96xf32> to vector<2x32xf32>
    %64 = math.tanh %62 : vector<2x32xf32>
    %65 = arith.mulf %63, %64 : vector<2x32xf32>
    %66 = vector.extract_strided_slice %5 {offsets = [6, 0], sizes = [2, 128], strides = [1, 1]} : vector<16x128xf32> to vector<2x128xf32>
    %cst_15 = arith.constant dense<0.000000e+00> : vector<2x128xf32>
    %67 = tpu.matmul %65, %6, %cst_15 {dimension_numbers = #tpu.dot_dimension_numbers<[1], [0], [0], [1], [0, 0, 1, 1], [], []>} : vector<2x32xf32>, vector<32x128xf32>, vector<2x128xf32> -> vector<2x128xf32>
    %68 = arith.addf %66, %67 : vector<2x128xf32>
    %69 = vector.extract_strided_slice %68 {offsets = [0, 0], sizes = [2, 96], strides = [1, 1]} : vector<2x128xf32> to vector<2x96xf32>
    %70 = arith.negf %69 : vector<2x96xf32>
    %71 = math.exp %70 : vector<2x96xf32>
    %cst_16 = arith.constant 1.000000e+00 : f32
    %72 = vector.broadcast %cst_16 : f32 to vector<2x96xf32>
    %73 = arith.addf %72, %71 : vector<2x96xf32>
    %74 = arith.divf %72, %73 : vector<2x96xf32>
    %75 = vector.extract_strided_slice %68 {offsets = [0, 96], sizes = [2, 32], strides = [1, 1]} : vector<2x128xf32> to vector<2x32xf32>
    %76 = math.tanh %75 : vector<2x32xf32>
    %77 = vector.extract_strided_slice %74 {offsets = [0, 32], sizes = [2, 32], strides = [1, 1]} : vector<2x96xf32> to vector<2x32xf32>
    %78 = arith.mulf %77, %62 : vector<2x32xf32>
    %79 = vector.extract_strided_slice %74 {offsets = [0, 0], sizes = [2, 32], strides = [1, 1]} : vector<2x96xf32> to vector<2x32xf32>
    %80 = arith.mulf %79, %76 : vector<2x32xf32>
    %81 = arith.addf %78, %80 : vector<2x32xf32>
    %82 = vector.extract_strided_slice %74 {offsets = [0, 64], sizes = [2, 32], strides = [1, 1]} : vector<2x96xf32> to vector<2x32xf32>
    %83 = math.tanh %81 : vector<2x32xf32>
    %84 = arith.mulf %82, %83 : vector<2x32xf32>
    %85 = vector.extract_strided_slice %5 {offsets = [8, 0], sizes = [2, 128], strides = [1, 1]} : vector<16x128xf32> to vector<2x128xf32>
    %cst_17 = arith.constant dense<0.000000e+00> : vector<2x128xf32>
    %86 = tpu.matmul %84, %6, %cst_17 {dimension_numbers = #tpu.dot_dimension_numbers<[1], [0], [0], [1], [0, 0, 1, 1], [], []>} : vector<2x32xf32>, vector<32x128xf32>, vector<2x128xf32> -> vector<2x128xf32>
    %87 = arith.addf %85, %86 : vector<2x128xf32>
    %88 = vector.extract_strided_slice %87 {offsets = [0, 0], sizes = [2, 96], strides = [1, 1]} : vector<2x128xf32> to vector<2x96xf32>
    %89 = arith.negf %88 : vector<2x96xf32>
    %90 = math.exp %89 : vector<2x96xf32>
    %cst_18 = arith.constant 1.000000e+00 : f32
    %91 = vector.broadcast %cst_18 : f32 to vector<2x96xf32>
    %92 = arith.addf %91, %90 : vector<2x96xf32>
    %93 = arith.divf %91, %92 : vector<2x96xf32>
    %94 = vector.extract_strided_slice %87 {offsets = [0, 96], sizes = [2, 32], strides = [1, 1]} : vector<2x128xf32> to vector<2x32xf32>
    %95 = math.tanh %94 : vector<2x32xf32>
    %96 = vector.extract_strided_slice %93 {offsets = [0, 32], sizes = [2, 32], strides = [1, 1]} : vector<2x96xf32> to vector<2x32xf32>
    %97 = arith.mulf %96, %81 : vector<2x32xf32>
    %98 = vector.extract_strided_slice %93 {offsets = [0, 0], sizes = [2, 32], strides = [1, 1]} : vector<2x96xf32> to vector<2x32xf32>
    %99 = arith.mulf %98, %95 : vector<2x32xf32>
    %100 = arith.addf %97, %99 : vector<2x32xf32>
    %101 = vector.extract_strided_slice %93 {offsets = [0, 64], sizes = [2, 32], strides = [1, 1]} : vector<2x96xf32> to vector<2x32xf32>
    %102 = math.tanh %100 : vector<2x32xf32>
    %103 = arith.mulf %101, %102 : vector<2x32xf32>
    %104 = vector.extract_strided_slice %5 {offsets = [10, 0], sizes = [2, 128], strides = [1, 1]} : vector<16x128xf32> to vector<2x128xf32>
    %cst_19 = arith.constant dense<0.000000e+00> : vector<2x128xf32>
    %105 = tpu.matmul %103, %6, %cst_19 {dimension_numbers = #tpu.dot_dimension_numbers<[1], [0], [0], [1], [0, 0, 1, 1], [], []>} : vector<2x32xf32>, vector<32x128xf32>, vector<2x128xf32> -> vector<2x128xf32>
    %106 = arith.addf %104, %105 : vector<2x128xf32>
    %107 = vector.extract_strided_slice %106 {offsets = [0, 0], sizes = [2, 96], strides = [1, 1]} : vector<2x128xf32> to vector<2x96xf32>
    %108 = arith.negf %107 : vector<2x96xf32>
    %109 = math.exp %108 : vector<2x96xf32>
    %cst_20 = arith.constant 1.000000e+00 : f32
    %110 = vector.broadcast %cst_20 : f32 to vector<2x96xf32>
    %111 = arith.addf %110, %109 : vector<2x96xf32>
    %112 = arith.divf %110, %111 : vector<2x96xf32>
    %113 = vector.extract_strided_slice %106 {offsets = [0, 96], sizes = [2, 32], strides = [1, 1]} : vector<2x128xf32> to vector<2x32xf32>
    %114 = math.tanh %113 : vector<2x32xf32>
    %115 = vector.extract_strided_slice %112 {offsets = [0, 32], sizes = [2, 32], strides = [1, 1]} : vector<2x96xf32> to vector<2x32xf32>
    %116 = arith.mulf %115, %100 : vector<2x32xf32>
    %117 = vector.extract_strided_slice %112 {offsets = [0, 0], sizes = [2, 32], strides = [1, 1]} : vector<2x96xf32> to vector<2x32xf32>
    %118 = arith.mulf %117, %114 : vector<2x32xf32>
    %119 = arith.addf %116, %118 : vector<2x32xf32>
    %120 = vector.extract_strided_slice %112 {offsets = [0, 64], sizes = [2, 32], strides = [1, 1]} : vector<2x96xf32> to vector<2x32xf32>
    %121 = math.tanh %119 : vector<2x32xf32>
    %122 = arith.mulf %120, %121 : vector<2x32xf32>
    %123 = vector.extract_strided_slice %5 {offsets = [12, 0], sizes = [2, 128], strides = [1, 1]} : vector<16x128xf32> to vector<2x128xf32>
    %cst_21 = arith.constant dense<0.000000e+00> : vector<2x128xf32>
    %124 = tpu.matmul %122, %6, %cst_21 {dimension_numbers = #tpu.dot_dimension_numbers<[1], [0], [0], [1], [0, 0, 1, 1], [], []>} : vector<2x32xf32>, vector<32x128xf32>, vector<2x128xf32> -> vector<2x128xf32>
    %125 = arith.addf %123, %124 : vector<2x128xf32>
    %126 = vector.extract_strided_slice %125 {offsets = [0, 0], sizes = [2, 96], strides = [1, 1]} : vector<2x128xf32> to vector<2x96xf32>
    %127 = arith.negf %126 : vector<2x96xf32>
    %128 = math.exp %127 : vector<2x96xf32>
    %cst_22 = arith.constant 1.000000e+00 : f32
    %129 = vector.broadcast %cst_22 : f32 to vector<2x96xf32>
    %130 = arith.addf %129, %128 : vector<2x96xf32>
    %131 = arith.divf %129, %130 : vector<2x96xf32>
    %132 = vector.extract_strided_slice %125 {offsets = [0, 96], sizes = [2, 32], strides = [1, 1]} : vector<2x128xf32> to vector<2x32xf32>
    %133 = math.tanh %132 : vector<2x32xf32>
    %134 = vector.extract_strided_slice %131 {offsets = [0, 32], sizes = [2, 32], strides = [1, 1]} : vector<2x96xf32> to vector<2x32xf32>
    %135 = arith.mulf %134, %119 : vector<2x32xf32>
    %136 = vector.extract_strided_slice %131 {offsets = [0, 0], sizes = [2, 32], strides = [1, 1]} : vector<2x96xf32> to vector<2x32xf32>
    %137 = arith.mulf %136, %133 : vector<2x32xf32>
    %138 = arith.addf %135, %137 : vector<2x32xf32>
    %139 = vector.extract_strided_slice %131 {offsets = [0, 64], sizes = [2, 32], strides = [1, 1]} : vector<2x96xf32> to vector<2x32xf32>
    %140 = math.tanh %138 : vector<2x32xf32>
    %141 = arith.mulf %139, %140 : vector<2x32xf32>
    %142 = vector.extract_strided_slice %5 {offsets = [14, 0], sizes = [2, 128], strides = [1, 1]} : vector<16x128xf32> to vector<2x128xf32>
    %cst_23 = arith.constant dense<0.000000e+00> : vector<2x128xf32>
    %143 = tpu.matmul %141, %6, %cst_23 {dimension_numbers = #tpu.dot_dimension_numbers<[1], [0], [0], [1], [0, 0, 1, 1], [], []>} : vector<2x32xf32>, vector<32x128xf32>, vector<2x128xf32> -> vector<2x128xf32>
    %144 = arith.addf %142, %143 : vector<2x128xf32>
    %145 = vector.extract_strided_slice %144 {offsets = [0, 0], sizes = [2, 96], strides = [1, 1]} : vector<2x128xf32> to vector<2x96xf32>
    %146 = arith.negf %145 : vector<2x96xf32>
    %147 = math.exp %146 : vector<2x96xf32>
    %cst_24 = arith.constant 1.000000e+00 : f32
    %148 = vector.broadcast %cst_24 : f32 to vector<2x96xf32>
    %149 = arith.addf %148, %147 : vector<2x96xf32>
    %150 = arith.divf %148, %149 : vector<2x96xf32>
    %151 = vector.extract_strided_slice %144 {offsets = [0, 96], sizes = [2, 32], strides = [1, 1]} : vector<2x128xf32> to vector<2x32xf32>
    %152 = math.tanh %151 : vector<2x32xf32>
    %153 = vector.extract_strided_slice %150 {offsets = [0, 32], sizes = [2, 32], strides = [1, 1]} : vector<2x96xf32> to vector<2x32xf32>
    %154 = arith.mulf %153, %138 : vector<2x32xf32>
    %155 = vector.extract_strided_slice %150 {offsets = [0, 0], sizes = [2, 32], strides = [1, 1]} : vector<2x96xf32> to vector<2x32xf32>
    %156 = arith.mulf %155, %152 : vector<2x32xf32>
    %157 = arith.addf %154, %156 : vector<2x32xf32>
    %158 = vector.extract_strided_slice %150 {offsets = [0, 64], sizes = [2, 32], strides = [1, 1]} : vector<2x96xf32> to vector<2x32xf32>
    %159 = math.tanh %157 : vector<2x32xf32>
    %160 = arith.mulf %158, %159 : vector<2x32xf32>
    %c0_25 = arith.constant 0 : index
    %c0_26 = arith.constant 0 : index
    %161 = vector.load %arg4[%c0_25, %c0_26] : memref<32x1xf32, #tpu.memory_space<vmem>>, vector<32x1xf32>
    %cst_27 = arith.constant dense<0.000000e+00> : vector<2x1xf32>
    %162 = tpu.matmul %160, %161, %cst_27 {dimension_numbers = #tpu.dot_dimension_numbers<[1], [0], [0], [1], [0, 0, 1, 1], [], []>} : vector<2x32xf32>, vector<32x1xf32>, vector<2x1xf32> -> vector<2x1xf32>
    %c0_28 = arith.constant 0 : index
    %c0_29 = arith.constant 0 : index
    %163 = vector.load %arg5[%c0_28, %c0_29] : memref<1x1xf32, #tpu.memory_space<vmem>>, vector<1x1xf32>
    %164 = vector.broadcast %163 : vector<1x1xf32> to vector<2x1xf32>
    %165 = arith.addf %162, %164 : vector<2x1xf32>
    %c0_30 = arith.constant 0 : index
    %c0_31 = arith.constant 0 : index
    %166 = vector.load %arg6[%c0_30, %c0_31] : memref<2x1xf32, #tpu.memory_space<vmem>>, vector<2x1xf32>
    tpu.vector_store %arg6[%c0_30, %c0_31], %165 {strides = array<i32>} : memref<2x1xf32, #tpu.memory_space<vmem>>, vector<2x1xf32>,
    return
  }
}

</mosaic_0001>

<bundles_post_ra>
// kernel: lstm_model_forward.1
= control target key start
LH: loop header
LB: loop body
LE: loop exit
PB: predicated region body
PF: predicated region fallthrough
CT: control target
= control target key end

     0   :  { %vm35_vm0 = vcmask 64512   ;;  %v1352_v0 = vmov 0.0|0.0   ;;  %vm1353_vm1 = vmmov 0   ;;  %v1354_v4 = vmov 0.0   ;;  %s1355_s10 = smov 32   ;;  %s1545_s2 = inlined_call_operand.vmem [shape: f32[32,128], index: 2, kind: input, shape index: {}]   ;;  %s1546_s1 = inlined_call_operand.vmem [shape: f32[8,128], index: 1, kind: input, shape index: {}]   ;;  %s1547_s0 = inlined_call_operand.vmem [shape: f32[16,8], index: 0, kind: input, shape index: {}]   ;;  %s1548_s3 = inlined_call_operand.vmem [shape: f32[1,128], index: 3, kind: input, shape index: {}]   ;;  %s1549_s4 = inlined_call_operand.vmem [shape: f32[32,1], index: 4, kind: input, shape index: {}]   ;;  %s1550_s5 = inlined_call_operand.<no memory space> [shape: f32[1,1], index: 5, kind: input, shape index: {}]   ;;  %s1551_s6 = inlined_call_operand.vmem [shape: f32[2,1], index: 6, kind: output, shape index: {}]  }
   0x1   :  { %1229 = vmatprep.subr.bf16.mxu1 %v1352_v0  ;;  %v117_v1 = vld [vmem:[%s1545_s2] sm:$0xff]  ;;  %v118_v2 = vld [vmem:[%s1545_s2 + $0x8] sm:$0xff]  ;;  %1138 = vmatprep.mubr.msk.f32.mxu1 %vm1353_vm1, %v1354_v4  ;;  %v119_v8 = vld [vmem:[%s1545_s2 + $0x10] sm:$0xff]  ;;  %vm121_vm2 = vcmask 261120   ;;  %vm1051_vm3 = vcmask 1024  }
   0x2   :  { %v27_v3 = vld [vmem:[%s1546_s1] sm:$0xff]  ;;  %v1404_v5 = vpack.c.bf16 %v118_v2, %v117_v1  ;;  %v26_v7 = vld [vmem:[%s1547_s0 + $0x8] sm:$0xff]  ;;  %v120_v9 = vld [vmem:[%s1545_s2 + $0x18] sm:$0xff] }
   0x3   :  { %1125 = vmatprep.subr.mxu0 %v27_v3  ;;  %v25_v6 = vld [vmem:[%s1547_s0] sm:$0xff]  ;;  %v1421_v10 = vpack.c.bf16 %v120_v9, %v119_v8 }
   0x4   :  { %1126 = vmatpush3.msra.mxu0 %v27_v3  ;;  %1127 = vmatprep.mubr.msk.f32.mxu0 %vm35_vm0, %v25_v6  ;;  %v1057_v11 = vld [vmem:[%s1548_s3] ss:$0 sm:$0xff]  ;;  %s1356_s3 = smov 64  }
   0x5   :  { %1231 = vmatpush3.bf16.msra.mxu1 %v1404_v5  ;;  %1128 = vmatmul.mubr.msk.f32.vlgmr.msra.gmra.mrb[0].mxu0 %vm35_vm0, %v26_v7 }
   0x6   :  { %1232 = vmatprep.subr.bf16.mxu1 %v1352_v0  ;;  %1235 = vmatprep.subr.bf16.mxu0 %v1352_v0 }
   0x7   :  { %1237 = vmatpush3.bf16.msra.mxu0 %v1404_v5  ;;  %1149 = vmatprep.mubr.msk.f32.mxu0 %vm1353_vm1, %v1354_v4 }
   0x8   :  { %1238 = vmatprep.subr.bf16.mxu0 %v1352_v0 }
   0x9   :  { %1234 = vmatpush3.bf16.msra.mxu1 %v1421_v10 }
   0xa   :  { %1241 = vmatprep.subr.bf16.mxu1 %v1352_v0 }
   0xb   :  { %1240 = vmatpush3.bf16.msra.mxu0 %v1421_v10 }
   0xc   :  { %1139 = vmatmul.mubr.f32.vlgmr.msra.gmra.mrb[0].mxu1 %v1354_v4  ;;  %1247 = vmatprep.subr.bf16.mxu0 %v1352_v0 }
   0xd   :  { %1243 = vmatpush3.bf16.msra.mxu1 %v1404_v5  ;;  %1160 = vmatprep.mubr.msk.f32.mxu1 %vm1353_vm1, %v1354_v4 }
   0xe   :  { %1244 = vmatprep.subr.bf16.mxu1 %v1352_v0 }
  0x11   :  { %1246 = vmatpush3.bf16.msra.mxu1 %v1421_v10 }
  0x12   :  { %1253 = vmatprep.subr.bf16.mxu1 %v1352_v0 }
  0xd8   :  { %v1129_v12 = vpop.f32.mrb[0].mxu0 }
  0xd9   :  { %v1443_v13 = vadd.f32 %v1129_v12, %v1057_v11  ;;  %v108_v14 = vpop.f32.mrb[1].mxu0 }
  0xda   :  { %v1445_v15 = vadd.f32 %v1057_v11, %v108_v14 }
  0xdf   :  { %v191_v16 = vpop.f32.mrb[0].mxu1 }
  0xe0   :  { %v195_v17 = vadd.f32 %v191_v16, %v1445_v15  ;;  %v1140_v18 = vpop.f32.mrb[1].mxu1 }
  0xe2   :  { %1288 = vtanh.f32 %v195_v17  ;;  %v1060_v20 = vmul.f32 -1.442695, %v195_v17 }
  0xe4   :  { %1290 = vpow2.f32 %v1060_v20 }
  0xec   :  { %v1289_v19 = vpop.eup %1288 }
  0xed   :  { %205 = vrot.lane.b32.xlu0 %v1289_v19, %s1355_s10 }
  0xee   :  { %v1291_v21 = vpop.eup %1290 }
  0xef   :  { %v199_v22 = vadd.f32 1.0, %v1291_v21 }
  0xf1   :  { %1292 = vrcp.f32 %v199_v22 }
  0xfb   :  { %v1293_v23 = vpop.eup %1292 }
  0xfc   :  { %v203_v26 = vmul.f32 0.0, %v1293_v23 }
 0x15f   :  { %v206_v24 = vpop.permute.xlu0 %205 }
 0x160   :  { %v208_v25 = vmul.f32 %v1293_v23, %v206_v24 }
 0x162   :  { %210 = vrot.lane.b32.xlu0 %v208_v25, %s1355_s10 }
 0x1d4   :  { %v211_v27 = vpop.permute.xlu0 %210 }
 0x1d5   :  { %v213_v28 = vadd.f32 %v211_v27, %v203_v26 }
 0x1d7   :  { %1294 = vtanh.f32 %v213_v28  ;;  %v307_v44 = vrot.slane %v213_v28, 6 }
 0x1e1   :  { %v1295_v29 = vpop.eup %1294 }
 0x1e2   :  { %216 = vrot.lane.b32.xlu1 %v1295_v29, %s1355_s10 }
 0x254   :  { %v217_v30 = vpop.permute.xlu1 %216 }
 0x255   :  { %v219_v31 = vmul.f32 %v1293_v23, %v217_v30 }
 0x257   :  { %221 = vrot.lane.b32.xlu1 %v219_v31, %s1356_s3 }
 0x2c9   :  { %v222_v32 = vpop.permute.xlu1 %221 }
 0x2ca   :  { %1150 = vmatmul.mubr.msk.f32.vlgmr.msra.gmra.mrb[2].mxu0 %vm121_vm2, %v222_v32 }
 0x2cb   :  { %1249 = vmatpush3.bf16.msra.mxu0 %v1404_v5  ;;  %1171 = vmatprep.mubr.msk.f32.mxu0 %vm1353_vm1, %v1354_v4 }
 0x2cc   :  { %1250 = vmatprep.subr.bf16.mxu0 %v1352_v0 }
 0x2cf   :  { %1252 = vmatpush3.bf16.msra.mxu0 %v1421_v10 }
 0x2d0   :  { %1259 = vmatprep.subr.bf16.mxu0 %v1352_v0 }
 0x39d   :  { %v291_v33 = vpop.f32.mrb[2].mxu0 }
 0x39e   :  { %v296_v34 = vrot.slane %v291_v33, 6  ;;  %v1151_v35 = vpop.f32.mrb[3].mxu0 }
 0x3a0   :  { %v298_v36 = vadd.f32 %v296_v34, %v1445_v15 }
 0x3a2   :  { %1296 = vtanh.f32 %v298_v36  ;;  %v1062_v38 = vmul.f32 -1.442695, %v298_v36 }
 0x3a4   :  { %1298 = vpow2.f32 %v1062_v38 }
 0x3ac   :  { %v1297_v37 = vpop.eup %1296 }
 0x3ad   :  { %311 = vrot.lane.b32.xlu0 %v1297_v37, %s1355_s10 }
 0x3ae   :  { %v1299_v39 = vpop.eup %1298 }
 0x3af   :  { %v302_v40 = vadd.f32 1.0, %v1299_v39 }
 0x3b1   :  { %1300 = vrcp.f32 %v302_v40 }
 0x3bb   :  { %v1301_v41 = vpop.eup %1300 }
 0x3bc   :  { %v309_v45 = vmul.f32 %v1301_v41, %v307_v44 }
 0x41f   :  { %v312_v42 = vpop.permute.xlu0 %311 }
 0x420   :  { %v314_v43 = vmul.f32 %v1301_v41, %v312_v42 }
 0x422   :  { %316 = vrot.lane.b32.xlu1 %v314_v43, %s1355_s10 }
 0x494   :  { %v317_v46 = vpop.permute.xlu1 %316 }
 0x495   :  { %v319_v47 = vadd.f32 %v317_v46, %v309_v45 }
 0x497   :  { %1302 = vtanh.f32 %v319_v47  ;;  %v414_v1 = vrot.slane %v319_v47, 6 }
 0x4a1   :  { %v1303_v48 = vpop.eup %1302 }
 0x4a2   :  { %322 = vrot.lane.b32.xlu0 %v1303_v48, %s1355_s10 }
 0x514   :  { %v323_v49 = vpop.permute.xlu0 %322 }
 0x515   :  { %v325_v50 = vmul.f32 %v1301_v41, %v323_v49 }
 0x517   :  { %v327_v51 = vrot.slane %v325_v50, 2 }
 0x519   :  { %328 = vrot.lane.b32.xlu1 %v327_v51, %s1356_s3 }
 0x58b   :  { %v329_v52 = vpop.permute.xlu1 %328 }
 0x58c   :  { %1161 = vmatmul.mubr.msk.f32.vlgmr.msra.gmra.mrb[2].mxu1 %vm121_vm2, %v329_v52 }
 0x58d   :  { %1255 = vmatpush3.bf16.msra.mxu1 %v1404_v5  ;;  %1182 = vmatprep.mubr.msk.f32.mxu1 %vm1353_vm1, %v1354_v4 }
 0x58e   :  { %1256 = vmatprep.subr.bf16.mxu1 %v1352_v0 }
 0x591   :  { %1258 = vmatpush3.bf16.msra.mxu1 %v1421_v10 }
 0x592   :  { %1265 = vmatprep.subr.bf16.mxu1 %v1352_v0 }
 0x65f   :  { %v398_v53 = vpop.f32.mrb[2].mxu1 }
 0x660   :  { %v403_v54 = vrot.slane %v398_v53, 4  ;;  %v1162_v55 = vpop.f32.mrb[3].mxu1 }
 0x662   :  { %v405_v56 = vadd.f32 %v403_v54, %v1445_v15 }
 0x664   :  { %1304 = vtanh.f32 %v405_v56  ;;  %v1064_v58 = vmul.f32 -1.442695, %v405_v56 }
 0x666   :  { %1306 = vpow2.f32 %v1064_v58 }
 0x66e   :  { %v1305_v57 = vpop.eup %1304 }
 0x66f   :  { %418 = vrot.lane.b32.xlu0 %v1305_v57, %s1355_s10 }
 0x670   :  { %v1307_v59 = vpop.eup %1306 }
 0x671   :  { %v409_v60 = vadd.f32 1.0, %v1307_v59 }
 0x673   :  { %1308 = vrcp.f32 %v409_v60 }
 0x67d   :  { %v1309_v61 = vpop.eup %1308 }
 0x67e   :  { %v416_v2 = vmul.f32 %v1309_v61, %v414_v1 }
 0x6e1   :  { %v419_v62 = vpop.permute.xlu0 %418 }
 0x6e2   :  { %v421_v63 = vmul.f32 %v1309_v61, %v419_v62 }
 0x6e4   :  { %423 = vrot.lane.b32.xlu1 %v421_v63, %s1355_s10 }
 0x756   :  { %v424_v3 = vpop.permute.xlu1 %423 }
 0x757   :  { %v426_v6 = vadd.f32 %v424_v3, %v416_v2 }
 0x759   :  { %1310 = vtanh.f32 %v426_v6  ;;  %v521_v26 = vrot.slane %v426_v6, 6 }
 0x763   :  { %v1311_v7 = vpop.eup %1310 }
 0x764   :  { %429 = vrot.lane.b32.xlu0 %v1311_v7, %s1355_s10 }
 0x7d6   :  { %v430_v8 = vpop.permute.xlu0 %429 }
 0x7d7   :  { %v432_v9 = vmul.f32 %v1309_v61, %v430_v8 }
 0x7d9   :  { %v434_v11 = vrot.slane %v432_v9, 4 }
 0x7db   :  { %435 = vrot.lane.b32.xlu1 %v434_v11, %s1356_s3 }
 0x84d   :  { %v436_v12 = vpop.permute.xlu1 %435 }
 0x84e   :  { %1172 = vmatmul.mubr.msk.f32.vlgmr.msra.gmra.mrb[4].mxu0 %vm121_vm2, %v436_v12 }
 0x84f   :  { %1261 = vmatpush3.bf16.msra.mxu0 %v1404_v5  ;;  %1193 = vmatprep.mubr.msk.f32.mxu0 %vm1353_vm1, %v1354_v4 }
 0x850   :  { %1262 = vmatprep.subr.bf16.mxu0 %v1352_v0 }
 0x853   :  { %1264 = vmatpush3.bf16.msra.mxu0 %v1421_v10 }
 0x854   :  { %1271 = vmatprep.subr.bf16.mxu0 %v1352_v0 }
 0x921   :  { %v505_v14 = vpop.f32.mrb[4].mxu0 }
 0x922   :  { %v510_v16 = vrot.slane %v505_v14, 2  ;;  %v1173_v17 = vpop.f32.mrb[5].mxu0 }
 0x924   :  { %v512_v18 = vadd.f32 %v510_v16, %v1445_v15 }
 0x926   :  { %1312 = vtanh.f32 %v512_v18  ;;  %v1066_v20 = vmul.f32 -1.442695, %v512_v18 }
 0x928   :  { %1314 = vpow2.f32 %v1066_v20 }
 0x930   :  { %v1313_v19 = vpop.eup %1312 }
 0x931   :  { %525 = vrot.lane.b32.xlu0 %v1313_v19, %s1355_s10 }
 0x932   :  { %v1315_v21 = vpop.eup %1314 }
 0x933   :  { %v516_v22 = vadd.f32 1.0, %v1315_v21 }
 0x935   :  { %1316 = vrcp.f32 %v516_v22 }
 0x93f   :  { %v1317_v23 = vpop.eup %1316 }
 0x940   :  { %v523_v27 = vmul.f32 %v1317_v23, %v521_v26 }
 0x9a3   :  { %v526_v24 = vpop.permute.xlu0 %525 }
 0x9a4   :  { %v528_v25 = vmul.f32 %v1317_v23, %v526_v24 }
 0x9a6   :  { %530 = vrot.lane.b32.xlu1 %v528_v25, %s1355_s10 }
 0xa18   :  { %v531_v28 = vpop.permute.xlu1 %530 }
 0xa19   :  { %v533_v29 = vadd.f32 %v531_v28, %v523_v27 }
 0xa1b   :  { %1318 = vtanh.f32 %v533_v29  ;;  %v625_v44 = vrot.slane %v533_v29, 6 }
 0xa25   :  { %v1319_v15 = vpop.eup %1318 }
 0xa26   :  { %536 = vrot.lane.b32.xlu0 %v1319_v15, %s1355_s10 }
 0xa98   :  { %v537_v30 = vpop.permute.xlu0 %536 }
 0xa99   :  { %v539_v31 = vmul.f32 %v1317_v23, %v537_v30 }
 0xa9b   :  { %v541_v32 = vrot.slane %v539_v31, 6 }
 0xa9d   :  { %542 = vrot.lane.b32.xlu1 %v541_v32, %s1356_s3 }
 0xb0f   :  { %v543_v33 = vpop.permute.xlu1 %542 }
 0xb10   :  { %1183 = vmatmul.mubr.msk.f32.vlgmr.msra.gmra.mrb[4].mxu1 %vm121_vm2, %v543_v33 }
 0xb11   :  { %1267 = vmatpush3.bf16.msra.mxu1 %v1404_v5  ;;  %1204 = vmatprep.mubr.msk.f32.mxu1 %vm1353_vm1, %v1354_v4 }
 0xb12   :  { %1268 = vmatprep.subr.bf16.mxu1 %v1352_v0 }
 0xb15   :  { %1270 = vmatpush3.bf16.msra.mxu1 %v1421_v10 }
 0xb16   :  { %1277 = vmatprep.subr.bf16.mxu1 %v1352_v0 }
 0xbe3   :  { %v612_v34 = vpop.f32.mrb[4].mxu1 }
 0xbe4   :  { %v616_v35 = vadd.f32 %v612_v34, %v1443_v13  ;;  %v1184_v36 = vpop.f32.mrb[5].mxu1 }
 0xbe6   :  { %1320 = vtanh.f32 %v616_v35  ;;  %v1068_v38 = vmul.f32 -1.442695, %v616_v35 }
 0xbe8   :  { %1322 = vpow2.f32 %v1068_v38 }
 0xbf0   :  { %v1321_v37 = vpop.eup %1320 }
 0xbf1   :  { %629 = vrot.lane.b32.xlu0 %v1321_v37, %s1355_s10 }
 0xbf2   :  { %v1323_v39 = vpop.eup %1322 }
 0xbf3   :  { %v620_v40 = vadd.f32 1.0, %v1323_v39 }
 0xbf5   :  { %1324 = vrcp.f32 %v620_v40 }
 0xbff   :  { %v1325_v41 = vpop.eup %1324 }
 0xc00   :  { %v627_v45 = vmul.f32 %v1325_v41, %v625_v44 }
 0xc63   :  { %v630_v42 = vpop.permute.xlu0 %629 }
 0xc64   :  { %v632_v43 = vmul.f32 %v1325_v41, %v630_v42 }
 0xc66   :  { %634 = vrot.lane.b32.xlu1 %v632_v43, %s1355_s10 }
 0xcd8   :  { %v635_v46 = vpop.permute.xlu1 %634 }
 0xcd9   :  { %v637_v47 = vadd.f32 %v635_v46, %v627_v45  ;;  %v965_v45 = vld [vmem:[%s1549_s4 + $0x8] sm:$0xff]  ;;  %v966_v46 = vld [vmem:[%s1549_s4 + $0x10] sm:$0xff] }
 0xcdb   :  { %1326 = vtanh.f32 %v637_v47 }
 0xce5   :  { %v1327_v48 = vpop.eup %1326 }
 0xce6   :  { %640 = vrot.lane.b32.xlu0 %v1327_v48, %s1355_s10  ;;  %v967_v48 = vld [vmem:[%s1549_s4 + $0x18] sm:$0xff] }
 0xd58   :  { %v641_v49 = vpop.permute.xlu0 %640 }
 0xd59   :  { %v643_v50 = vmul.f32 %v1325_v41, %v641_v49  ;;  %v1281_v49 = vpack.c.bf16 %v967_v48, %v966_v46 }
 0xd5b   :  { %645 = vrot.lane.b32.xlu1 %v643_v50, %s1356_s3 }
 0xdcd   :  { %v646_v51 = vpop.permute.xlu1 %645 }
 0xdce   :  { %1194 = vmatmul.mubr.msk.f32.vlgmr.msra.gmra.mrb[6].mxu0 %vm121_vm2, %v646_v51  ;;  %v11_v51 = vstv %s1550_s5 }
 0xdcf   :  { %1273 = vmatpush3.bf16.msra.mxu0 %v1404_v5  ;;  %1215 = vmatprep.mubr.msk.f32.mxu0 %vm1353_vm1, %v1354_v4  ;;  %12 = vst [vmem:[#allocation2] sm:$0x1] %v11_v51 }
 0xdd0   :  { %1274 = vmatprep.subr.bf16.mxu0 %v1352_v0 }
 0xdd3   :  { %1276 = vmatpush3.bf16.msra.mxu0 %v1421_v10  ;;  %v731_v10 = vrot.slane %v637_v47, 6 }
 0xea1   :  { %v715_v52 = vpop.f32.mrb[6].mxu0 }
 0xea2   :  { %v720_v53 = vrot.slane %v715_v52, 6  ;;  %v1195_v54 = vpop.f32.mrb[7].mxu0 }
 0xea4   :  { %v722_v55 = vadd.f32 %v720_v53, %v1443_v13 }
 0xea6   :  { %1328 = vtanh.f32 %v722_v55  ;;  %v1070_v57 = vmul.f32 -1.442695, %v722_v55 }
 0xea8   :  { %1330 = vpow2.f32 %v1070_v57 }
 0xeb0   :  { %v1329_v56 = vpop.eup %1328 }
 0xeb1   :  { %735 = vrot.lane.b32.xlu0 %v1329_v56, %s1355_s10  ;;  %v1075_v56 = vld [vmem:[#allocation2] ss:$0 sm:$0xff] }
 0xeb2   :  { %v1331_v58 = vpop.eup %1330 }
 0xeb3   :  { %v726_v5 = vadd.f32 1.0, %v1331_v58 }
 0xeb5   :  { %1332 = vrcp.f32 %v726_v5 }
 0xebf   :  { %v1333_v59 = vpop.eup %1332 }
 0xec0   :  { %v733_v62 = vmul.f32 %v1333_v59, %v731_v10 }
 0xf23   :  { %v736_v60 = vpop.permute.xlu0 %735 }
 0xf24   :  { %v738_v61 = vmul.f32 %v1333_v59, %v736_v60 }
 0xf26   :  { %740 = vrot.lane.b32.xlu1 %v738_v61, %s1355_s10 }
 0xf98   :  { %v741_v63 = vpop.permute.xlu1 %740 }
 0xf99   :  { %v743_v1 = vadd.f32 %v741_v63, %v733_v62 }
 0xf9b   :  { %1334 = vtanh.f32 %v743_v1 }
 0xfa5   :  { %v1335_v2 = vpop.eup %1334 }
 0xfa6   :  { %746 = vrot.lane.b32.xlu0 %v1335_v2, %s1355_s10 }
0x1018   :  { %v747_v3 = vpop.permute.xlu0 %746 }
0x1019   :  { %v749_v6 = vmul.f32 %v1333_v59, %v747_v3 }
0x101b   :  { %v751_v7 = vrot.slane %v749_v6, 2 }
0x101d   :  { %752 = vrot.lane.b32.xlu1 %v751_v7, %s1356_s3 }
0x108f   :  { %v753_v8 = vpop.permute.xlu1 %752 }
0x1090   :  { %1205 = vmatmul.mubr.msk.f32.vlgmr.msra.gmra.mrb[6].mxu1 %vm121_vm2, %v753_v8 }
0x1091   :  { %1226 = vmatprep.mubr.msk.f32.mxu1 %vm1353_vm1, %v1354_v4  ;;  %v838_v4 = vrot.slane %v743_v1, 6 }
0x1163   :  { %v822_v9 = vpop.f32.mrb[6].mxu1 }
0x1164   :  { %v827_v11 = vrot.slane %v822_v9, 4  ;;  %v1206_v12 = vpop.f32.mrb[7].mxu1 }
0x1166   :  { %v829_v14 = vadd.f32 %v827_v11, %v1443_v13 }
0x1168   :  { %1336 = vtanh.f32 %v829_v14  ;;  %v1072_v17 = vmul.f32 -1.442695, %v829_v14 }
0x116a   :  { %1338 = vpow2.f32 %v1072_v17 }
0x1172   :  { %v1337_v16 = vpop.eup %1336 }
0x1173   :  { %842 = vrot.lane.b32.xlu0 %v1337_v16, %s1355_s10 }
0x1174   :  { %v1339_v18 = vpop.eup %1338 }
0x1175   :  { %v833_v19 = vadd.f32 1.0, %v1339_v18 }
0x1177   :  { %1340 = vrcp.f32 %v833_v19 }
0x1181   :  { %v1341_v20 = vpop.eup %1340 }
0x1182   :  { %v840_v23 = vmul.f32 %v1341_v20, %v838_v4 }
0x11e5   :  { %v843_v21 = vpop.permute.xlu0 %842 }
0x11e6   :  { %v845_v22 = vmul.f32 %v1341_v20, %v843_v21 }
0x11e8   :  { %847 = vrot.lane.b32.xlu1 %v845_v22, %s1355_s10 }
0x125a   :  { %v848_v24 = vpop.permute.xlu1 %847 }
0x125b   :  { %v850_v25 = vadd.f32 %v848_v24, %v840_v23 }
0x125d   :  { %1342 = vtanh.f32 %v850_v25  ;;  %v945_v41 = vrot.slane %v850_v25, 6 }
0x1267   :  { %v1343_v26 = vpop.eup %1342 }
0x1268   :  { %853 = vrot.lane.b32.xlu0 %v1343_v26, %s1355_s10 }
0x12da   :  { %v854_v27 = vpop.permute.xlu0 %853 }
0x12db   :  { %v856_v28 = vmul.f32 %v1341_v20, %v854_v27 }
0x12dd   :  { %v858_v29 = vrot.slane %v856_v28, 4 }
0x12df   :  { %859 = vrot.lane.b32.xlu1 %v858_v29, %s1356_s3 }
0x1351   :  { %v860_v15 = vpop.permute.xlu1 %859 }
0x1352   :  { %1216 = vmatmul.mubr.msk.f32.vlgmr.msra.gmra.mrb[8].mxu0 %vm121_vm2, %v860_v15 }
0x1425   :  { %v929_v30 = vpop.f32.mrb[8].mxu0 }
0x1426   :  { %v934_v31 = vrot.slane %v929_v30, 2  ;;  %v1217_v32 = vpop.f32.mrb[9].mxu0 }
0x1428   :  { %v936_v33 = vadd.f32 %v934_v31, %v1443_v13  ;;  %v964_v13 = vld [vmem:[%s1549_s4] sm:$0xff] }
0x1429   :  { %v1278_v47 = vpack.c.bf16 %v965_v45, %v964_v13 }
0x142a   :  { %1344 = vtanh.f32 %v936_v33  ;;  %v1074_v35 = vmul.f32 -1.442695, %v936_v33 }
0x142b   :  { %1279 = vmatpush3.bf16.msra.mxu1 %v1278_v47 }
0x142c   :  { %1346 = vpow2.f32 %v1074_v35  ;;  %1280 = vmatprep.subr.bf16.mxu1 %v1352_v0 }
0x142f   :  { %1282 = vmatpush3.bf16.msra.mxu1 %v1281_v49 }
0x1434   :  { %v1345_v34 = vpop.eup %1344 }
0x1435   :  { %949 = vrot.lane.b32.xlu0 %v1345_v34, %s1355_s10 }
0x1436   :  { %v1347_v36 = vpop.eup %1346 }
0x1437   :  { %v940_v37 = vadd.f32 1.0, %v1347_v36 }
0x1439   :  { %1348 = vrcp.f32 %v940_v37 }
0x1443   :  { %v1349_v38 = vpop.eup %1348 }
0x1444   :  { %v947_v42 = vmul.f32 %v1349_v38, %v945_v41 }
0x14a7   :  { %v950_v39 = vpop.permute.xlu0 %949 }
0x14a8   :  { %v952_v40 = vmul.f32 %v1349_v38, %v950_v39 }
0x14aa   :  { %954 = vrot.lane.b32.xlu1 %v952_v40, %s1355_s10 }
0x151c   :  { %v955_v43 = vpop.permute.xlu1 %954 }
0x151d   :  { %v957_v44 = vadd.f32 %v955_v43, %v947_v42 }
0x151f   :  { %1350 = vtanh.f32 %v957_v44 }
0x1529   :  { %v1351_v50 = vpop.eup %1350 }
0x152a   :  { %960 = vrot.lane.b32.xlu0 %v1351_v50, %s1355_s10 }
0x159c   :  { %v961_v52 = vpop.permute.xlu0 %960 }
0x159d   :  { %v963_v53 = vmul.f32 %v1349_v38, %v961_v52 }
0x159f   :  { %v976_v54 = vrot.slane %v963_v53, 6 }
0x15a1   :  { %977 = vrot.lane.b32.xlu1 %v976_v54, %s1356_s3 }
0x1613   :  { %v978_v55 = vpop.permute.xlu1 %977 }
0x1614   :  { %1227 = vmatmul.mubr.msk.f32.vlgmr.msra.gmra.mrb[8].mxu1 %vm121_vm2, %v978_v55 }
0x16e7   :  { %v1047_v57 = vpop.f32.mrb[8].mxu1 }
0x16e8   :  { %v1048_v0 = vadd.f32 %v1075_v56, %v1047_v57  ;;  %v1228_v58 = vpop.f32.mrb[9].mxu1 }
0x16ea   :  { %1052 = vst.msk [vmem:[%s1551_s6] sm:$0x3] %vm1051_vm3, %v1048_v0 }

</bundles_post_ra>
